<compile_context>
chip_gen: v7x
topology: tpu7x:2x2x1
jax: 0.10.0
libtpu: 0.0.40
codegen_flags: <defaults>
</compile_context>

<pallas_src>
import math

import jax
import jax.numpy as jnp
from jax.experimental import pallas as pl
from jax.experimental.pallas import tpu as pltpu


# --------------------------------------------------------------------------- #
# Kernel
# --------------------------------------------------------------------------- #
def _pos_encoding_kernel(x_ref, pe_ref, o_ref):
    # x_ref/o_ref: (TS, L) row tile; pe_ref: (1, L) block with a constant index
    # map, so it is DMA'd once and stays resident in VMEM across grid steps.
    # Add in float32 (matches torch promotion of x against the float32 buffer),
    # then cast to the output dtype.
    o_ref[...] = (
        x_ref[...].astype(jnp.float32) + pe_ref[...].astype(jnp.float32)
    ).astype(o_ref.dtype)
    # TODO(synk): training-mode dropout (p=0.1) is not reproduced (PyTorch RNG
    # stream).  If ever needed it can be fused here for free (HBM-bound kernel,
    # idle VPU/EUP) via pltpu.prng_seed + pltpu.prng_random_bits + compare/scale.


# --------------------------------------------------------------------------- #
# Positional-encoding table (matches the torch buffer init)
# --------------------------------------------------------------------------- #
def make_pe_table(d_model: int, max_len: int = 5000) -> jnp.ndarray:
    if d_model % 2 != 0:
        raise ValueError("d_model must be even (matches the torch module).")
    position = jnp.arange(max_len, dtype=jnp.float32)[:, None]            # (max_len, 1)
    div_term = jnp.exp(
        jnp.arange(0, d_model, 2, dtype=jnp.float32) * (-math.log(10000.0) / d_model)
    )                                                                      # (d_model/2,)
    args = position * div_term                                             # (max_len, d_model/2)
    pe = jnp.stack([jnp.sin(args), jnp.cos(args)], axis=-1)                # interleave sin/cos
    return pe.reshape(max_len, d_model)                                    # (max_len, d_model)


# --------------------------------------------------------------------------- #
# Tiling heuristics
# --------------------------------------------------------------------------- #
def _sublane_packing(dtype) -> int:
    """Sublane row packing per dtype: 8 (f32), 16 (bf16/f16), 32 (int8/fp8)."""
    return 8 * max(1, 4 // jnp.dtype(dtype).itemsize)


def _choose_fold(seq_len: int, bd: int, max_fold: int = 64) -> int:
    """Fold factor f: f consecutive sequence rows are flattened onto the lane
    axis so the lane width f*B*D is a multiple of 128 (unmasked, lane-dense
    stores -- the biggest measured store-path lever).  Returns 1 when B*D is
    already a multiple of 128 or no small divisor of S works."""
    if bd % 128 == 0:
        return 1
    g = 128 // math.gcd(bd, 128)          # smallest f with (f * bd) % 128 == 0
    f = g
    while f <= min(seq_len, max_fold):
        if seq_len % f == 0:
            return f
        f += g
    return 1                               # fall back to masked stores (still correct)


def _choose_tile_rows(n_rows: int, row_bytes: int, packing: int,
                      target_tile_bytes: int = 4 * 1024 * 1024,
                      max_tile_bytes: int = 6 * 1024 * 1024) -> int:
    """Row-tile size for the pipelined grid:
       * ~4 MiB per tile (the ~0.35us per-grid-step cost stays well under 5%)
       * <= 6 MiB per tile so the double-buffered x+out working set stays
         <= ~26 MiB (v7x: 64 MiB physical / 32 MiB scoped VMEM)
       * never collapse to a single grid step when >=2 (ideally >=4) tiles are
         possible, so both v7x TensorCores get work under "parallel"
       * multiple of the dtype sublane packing, or the full extent."""
    if n_rows <= packing:
        return n_rows
    row_bytes = max(row_bytes, 1)
    ts = max(1, target_tile_bytes // row_bytes)
    ts = min(ts, max(1, max_tile_bytes // row_bytes))
    # Keep enough grid steps for megacore sharding.
    if n_rows >= 4 * packing:
        min_steps = 4
    elif n_rows >= 2 * packing:
        min_steps = 2
    else:
        min_steps = 1
    ts = min(ts, -(-n_rows // min_steps))          # ceil(n_rows / min_steps)
    ts = max(packing, (ts // packing) * packing)   # sublane-packing multiple
    return min(ts, n_rows)


# --------------------------------------------------------------------------- #
# Forward builder (one-time setup per shape/dtype) and public wrappers
# --------------------------------------------------------------------------- #
def _build_forward(x_shape, x_dtype, pe: jnp.ndarray, donate_x: bool):
    S, B, D = x_shape
    max_len, d_model = pe.shape
    if D != d_model:
        raise ValueError(f"embed dim mismatch: x has {D}, pe table has {d_model}")
    if B > max_len:
        # torch's `pe[:, :x.size(1), :]` would shape-mismatch here as well.
        raise ValueError(f"batch size {B} exceeds max_len {max_len}")

    x_dtype = jnp.dtype(x_dtype)
    out_dtype = jnp.promote_types(x_dtype, pe.dtype)   # torch: x + float32 buffer

    BD = B * D
    fold = _choose_fold(S, BD)
    rows, lanes = S // fold, fold * BD

    # One-time pe operand prep (hoisted out of the per-call path): slice by the
    # *batch* axis (verbatim `pe[:, :x.size(1), :]`), flatten onto lanes, and
    # replicate across the folded sequence rows (pe does not depend on s).
    pe_row = jnp.tile(pe[:B].reshape(1, BD), (1, fold))

    x_item = x_dtype.itemsize
    o_item = jnp.dtype(out_dtype).itemsize
    pe_item = jnp.dtype(pe.dtype).itemsize
    packing = max(_sublane_packing(x_dtype), _sublane_packing(out_dtype))
    ts = _choose_tile_rows(rows, lanes * max(x_item, o_item), packing)
    grid = (pl.cdiv(rows, ts),)

    # VMEM budget: double-buffered x and out tiles + resident pe row + margin.
    vmem_bytes = (2 * ts * lanes * x_item + 2 * ts * lanes * o_item
                  + 2 * lanes * pe_item + (2 << 20))
    vmem_bytes = int(min(max(vmem_bytes, 16 << 20), 32 << 20))

    if donate_x and out_dtype != x_dtype:
        donate_x = False                    # aliasing needs identical shape+dtype

    call = pl.pallas_call(
        _pos_encoding_kernel,
        out_shape=jax.ShapeDtypeStruct((rows, lanes), out_dtype),
        grid=grid,
        in_specs=[
            pl.BlockSpec((ts, lanes), lambda i: (i, 0)),   # x tile (auto double-buffered)
            # pe: constant index map -> one DMA, VMEM-resident across grid steps.
            # (A single pipeline buffer would only save ~lanes*4 bytes, so we keep
            # the default buffering rather than rely on pipeline_mode support.)
            pl.BlockSpec((1, lanes), lambda i: (0, 0)),
        ],
        out_specs=pl.BlockSpec((ts, lanes), lambda i: (i, 0)),
        compiler_params=pltpu.CompilerParams(
            dimension_semantics=("parallel",),             # megacore sharding on v7x
            vmem_limit_bytes=vmem_bytes,
        ),
        cost_estimate=pl.CostEstimate(
            flops=S * BD,
            transcendentals=0,
            bytes_accessed=S * BD * (x_item + o_item) + lanes * pe_item,
        ),
        input_output_aliases=({0: 0} if donate_x else {}),
    )

    def forward(x):
        out2d = call(x.reshape(rows, lanes), pe_row)
        return out2d.reshape(S, B, D)

    return jax.jit(forward)


def make_positional_encoding(d_model: int, max_len: int = 5000):
    """Returns forward(x) mirroring PositionalEncoding(d_model) in eval mode.
    The pe-table prep and pallas_call construction are cached per input
    shape/dtype (hoisted out of the steady-state per-call path)."""
    pe = make_pe_table(d_model, max_len)
    cache = {}

    def forward(x, donate_x: bool = False):
        key = (tuple(x.shape), str(jnp.dtype(x.dtype)), bool(donate_x))
        fn = cache.get(key)
        if fn is None:
            fn = _build_forward(x.shape, x.dtype, pe, donate_x)
            cache[key] = fn
        return fn(x)

    return forward


def positional_encoding_forward(x: jnp.ndarray, pe: jnp.ndarray, *,
                                donate_x: bool = False) -> jnp.ndarray:
    """Functional one-shot API: x [S, B, D], pe [max_len, D] -> [S, B, D]."""
    return _build_forward(x.shape, x.dtype, pe, donate_x)(x)


# --------------------------------------------------------------------------- #
# Demo / self-check
# --------------------------------------------------------------------------- #
if __name__ == "__main__":
    key = jax.random.PRNGKey(0)
    k1, k2 = jax.random.split(key)

    # Case 1: tiny shapes consistent with the module (seq=8, batch=2, d_model=32).
    S, B, D = 8, 2, 32
    pos_encoder = make_positional_encoding(D, max_len=64)
    x = jax.random.normal(k1, (S, B, D), dtype=jnp.float32)
    out = jax.block_until_ready(pos_encoder(x))
    pe = make_pe_table(D, 64)
    ref = x + pe[None, :B, :]                 # torch broadcast: slice by *batch* axis
    assert out.shape == (S, B, D) and out.dtype == ref.dtype
    assert jnp.allclose(out, ref, atol=1e-6), "case-1 mismatch vs reference"

    # Case 2: exercises the multi-step, lane-dense, parallel-grid path.
    S2, B2, D2 = 256, 4, 128
    pos_encoder2 = make_positional_encoding(D2, max_len=512)
    x2 = jax.random.normal(k2, (S2, B2, D2), dtype=jnp.float32)
    out2 = jax.block_until_ready(pos_encoder2(x2))
    pe2 = make_pe_table(D2, 512)
    ref2 = x2 + pe2[None, :B2, :]
    assert out2.shape == (S2, B2, D2)
    assert jnp.allclose(out2, ref2, atol=1e-6), "case-2 mismatch vs reference"

    print("KERNEL_OK")
</pallas_src>

<mosaic_0001>
module attributes {stable_mosaic.version = 11 : i64} {
  func.func @_pos_encoding_kernel(%arg0: i32, %arg1: memref<4x128xf32, #tpu.memory_space<vmem>>, %arg2: memref<1x128xf32, #tpu.memory_space<vmem>>, %arg3: memref<4x128xf32, #tpu.memory_space<vmem>>) attributes {dimension_semantics = [#tpu.dimension_semantics<parallel>], iteration_bounds = array<i64: 1>, scalar_prefetch = 0 : i64, scratch_operands = 0 : i64, tpu.core_type = #tpu.core_type<tc>, window_params = [{transform_indices = @transform_0, window_bounds = array<i64: 4, 128>}, {pipeline_mode = #tpu.pipeline_mode<synchronous>, transform_indices = @transform_1, window_bounds = array<i64: 1, 128>}, {transform_indices = @transform_2, window_bounds = array<i64: 4, 128>}]} {
    %c0 = arith.constant 0 : index
    %c0_0 = arith.constant 0 : index
    %0 = vector.load %arg1[%c0, %c0_0] : memref<4x128xf32, #tpu.memory_space<vmem>>, vector<4x128xf32>
    %c0_1 = arith.constant 0 : index
    %c0_2 = arith.constant 0 : index
    %1 = vector.load %arg2[%c0_1, %c0_2] : memref<1x128xf32, #tpu.memory_space<vmem>>, vector<1x128xf32>
    %2 = vector.broadcast %1 : vector<1x128xf32> to vector<4x128xf32>
    %3 = arith.addf %0, %2 : vector<4x128xf32>
    %c0_3 = arith.constant 0 : index
    %c0_4 = arith.constant 0 : index
    %4 = vector.load %arg3[%c0_3, %c0_4] : memref<4x128xf32, #tpu.memory_space<vmem>>, vector<4x128xf32>
    tpu.vector_store %arg3[%c0_3, %c0_4], %3 {strides = array<i32>} : memref<4x128xf32, #tpu.memory_space<vmem>>, vector<4x128xf32>,
    return
  }
  func.func @transform_0(%arg0: i32) -> (i32, i32) {
    %c0_i32 = arith.constant 0 : i32
    %c0_i32_0 = arith.constant 0 : i32
    return %arg0, %c0_i32 : i32, i32
  }
  func.func @transform_1(%arg0: i32) -> (i32, i32) {
    %c0_i32 = arith.constant 0 : i32
    %c0_i32_0 = arith.constant 0 : i32
    %c0_i32_1 = arith.constant 0 : i32
    return %c0_i32, %c0_i32_0 : i32, i32
  }
  func.func @transform_2(%arg0: i32) -> (i32, i32) {
    %c0_i32 = arith.constant 0 : i32
    %c0_i32_0 = arith.constant 0 : i32
    return %arg0, %c0_i32 : i32, i32
  }
}

</mosaic_0001>

<bundles_post_ra>
// kernel: forward.1
= control target key start
LH: loop header
LB: loop body
LE: loop exit
PB: predicated region body
PF: predicated region fallthrough
CT: control target
= control target key end

     0   :  { %s50_s0 = inlined_call_operand.vmem [shape: f32[4,128], index: 0, kind: input, shape index: {}]   ;;  %s51_s1 = inlined_call_operand.vmem [shape: f32[1,128], index: 1, kind: input, shape index: {}]   ;;  %s52_s2 = inlined_call_operand.vmem [shape: f32[4,128], index: 2, kind: output, shape index: {}]  }
   0x1   :  { %v11_v0 = vld [vmem:[%s50_s0] sm:$0xf] }
   0x2   :  { %v25_v1 = vld [vmem:[%s51_s1] ss:$0 sm:$0xff] }
   0x3   :  { %v19_v2 = vadd.f32 %v25_v1, %v11_v0 }
   0x5   :  { %20 = vst [vmem:[%s52_s2] sm:$0xf] %v19_v2 }

</bundles_post_ra>
